<compile_context>
chip_gen: v6e
topology: v6e:2x2x1
jax: 0.10.0
libtpu: 0.0.40
codegen_flags: <defaults>
</compile_context>

<pallas_src>
import functools

import jax
import jax.numpy as jnp
from jax.experimental import pallas as pl
from jax.experimental.pallas import tpu as pltpu


def _round_up(x, m):
    return (x + m - 1) // m * m


def _patch_embed_kernel(x_ref, w_ref, b_ref, o_ref):
    # x_ref: [TM, K_pad] (bf16)   w_ref: [K_pad, TE] (bf16)
    # b_ref: [1, TE]     (f32)    o_ref: [TM, TE]
    acc = jnp.dot(x_ref[...], w_ref[...], preferred_element_type=jnp.float32)
    o_ref[...] = (acc + b_ref[...]).astype(o_ref.dtype)


def patch_embed(x, weight, bias, patch_size, flatten=True,
                compute_dtype=jnp.bfloat16):
    """x: [B, C, H, W] (NCHW, like PyTorch).
    weight: [E, C, ph, pw] (PyTorch Conv2d layout).  bias: [E].
    Returns [B, N, E] if flatten else [B, E, Gh, Gw].
    """
    B, C, H, W = x.shape
    ph, pw = patch_size
    E = weight.shape[0]
    gh, gw = H // ph, W // pw
    n = gh * gw
    K = C * ph * pw
    M = B * n
    out_dtype = x.dtype

    # ---- tiling / padding choices (lane-dense, MXU-friendly) ----
    K_pad = _round_up(K, 128)
    E_pad = _round_up(E, 128)
    TM = min(512, _round_up(M, 16))
    M_pad = _round_up(M, TM)
    TE = 256 if (E_pad % 256 == 0) else 128
    grid = (M_pad // TM, E_pad // TE)

    # ---- glue: extract non-overlapping patches, flatten as (c, kh, kw) ----
    xp = x.reshape(B, C, gh, ph, gw, pw)
    xp = jnp.transpose(xp, (0, 2, 4, 1, 3, 5)).reshape(M, K)  # [M, K]
    xp = xp.astype(compute_dtype)
    if M_pad != M or K_pad != K:
        xp = jnp.pad(xp, ((0, M_pad - M), (0, K_pad - K)))

    w2d = weight.reshape(E, K).T.astype(compute_dtype)        # [K, E]
    if K_pad != K or E_pad != E:
        w2d = jnp.pad(w2d, ((0, K_pad - K), (0, E_pad - E)))
    b2d = bias.astype(jnp.float32).reshape(1, E)              # [1, E]
    if E_pad != E:
        b2d = jnp.pad(b2d, ((0, 0), (0, E_pad - E)))

    out = pl.pallas_call(
        _patch_embed_kernel,
        out_shape=jax.ShapeDtypeStruct((M_pad, E_pad), out_dtype),
        grid_spec=pltpu.PrefetchScalarGridSpec(
            num_scalar_prefetch=0,
            grid=grid,
            in_specs=[
                pl.BlockSpec((TM, K_pad), lambda i, j: (i, 0)),   # patches
                pl.BlockSpec((K_pad, TE), lambda i, j: (0, j)),   # weight
                pl.BlockSpec((1, TE), lambda i, j: (0, j)),       # bias
            ],
            out_specs=pl.BlockSpec((TM, TE), lambda i, j: (i, j)),
        ),
        compiler_params=pltpu.CompilerParams(
            dimension_semantics=("parallel", "parallel"),
            allow_input_fusion=[True, False, False],
        ),
    )(xp, w2d, b2d)

    out = out[:M, :E].reshape(B, n, E)                        # [B, N, E]
    if not flatten:
        out = jnp.transpose(out.reshape(B, gh, gw, E), (0, 3, 1, 2))
    # norm_layer=None => nn.Identity()
    return out


def _reference(x, weight, bias, patch_size, compute_dtype=jnp.bfloat16):
    # Pure-JAX reference: strided conv (NCHW) with the same bf16-in / f32-acc
    # numerics as the kernel.
    y = jax.lax.conv_general_dilated(
        x.astype(compute_dtype), weight.astype(compute_dtype),
        window_strides=patch_size, padding="VALID",
        dimension_numbers=("NCHW", "OIHW", "NCHW"),
        preferred_element_type=jnp.float32)
    y = y + bias.astype(jnp.float32).reshape(1, -1, 1, 1)
    y = y.astype(x.dtype)
    B, E, gh, gw = y.shape
    return jnp.transpose(y.reshape(B, E, gh * gw), (0, 2, 1))  # [B, N, E]


def _reference_f32(x, weight, bias, patch_size):
    y = jax.lax.conv_general_dilated(
        x, weight, window_strides=patch_size, padding="VALID",
        dimension_numbers=("NCHW", "OIHW", "NCHW"))
    y = y + bias.reshape(1, -1, 1, 1)
    B, E, gh, gw = y.shape
    return jnp.transpose(y.reshape(B, E, gh * gw), (0, 2, 1))


if __name__ == "__main__":
    # Small shapes consistent with the module: img=16, patch=4, C=4, E=32.
    B, C, H, W = 2, 4, 16, 16
    ph, pw = 4, 4
    E = 32

    key = jax.random.PRNGKey(0)
    kx, kw, kb = jax.random.split(key, 3)
    x = jax.random.normal(kx, (B, C, H, W), dtype=jnp.float32)
    weight = jax.random.normal(kw, (E, C, ph, pw), dtype=jnp.float32) * 0.02
    bias = jax.random.normal(kb, (E,), dtype=jnp.float32) * 0.02

    fn = jax.jit(functools.partial(patch_embed, patch_size=(ph, pw), flatten=True))
    out = jax.block_until_ready(fn(x, weight, bias))

    ref_bf16 = jax.block_until_ready(_reference(x, weight, bias, (ph, pw)))
    ref_f32 = jax.block_until_ready(_reference_f32(x, weight, bias, (ph, pw)))

    assert out.shape == (B, (H // ph) * (W // pw), E), out.shape
    # Same-precision check (bf16 operands, f32 accumulation) -- tight.
    assert jnp.allclose(out, ref_bf16, atol=2e-3, rtol=2e-2), "mismatch vs bf16 reference"
    # Sanity vs the full-f32 PyTorch-semantics reference -- loose (bf16 inputs).
    assert jnp.allclose(out, ref_f32, atol=5e-2, rtol=5e-2), "mismatch vs f32 reference"

    print("KERNEL_OK")
</pallas_src>

<mosaic_0001>
module attributes {stable_mosaic.version = 11 : i64} {
  func.func @_patch_embed_kernel(%arg0: i32, %arg1: i32, %arg2: memref<32x128xbf16, #tpu.memory_space<vmem>>, %arg3: memref<128x128xbf16, #tpu.memory_space<vmem>>, %arg4: memref<1x128xf32, #tpu.memory_space<vmem>>, %arg5: memref<32x128xf32, #tpu.memory_space<vmem>>) attributes {dimension_semantics = [#tpu.dimension_semantics<parallel>, #tpu.dimension_semantics<parallel>], iteration_bounds = array<i64: 1, 1>, scalar_prefetch = 0 : i64, scratch_operands = 0 : i64, tpu.core_type = #tpu.core_type<tc>, window_params = [{transform_indices = @transform_0, window_bounds = array<i64: 32, 128>}, {transform_indices = @transform_1, window_bounds = array<i64: 128, 128>}, {transform_indices = @transform_2, window_bounds = array<i64: 1, 128>}, {transform_indices = @transform_3, window_bounds = array<i64: 32, 128>}]} {
    %c0 = arith.constant 0 : index
    %c0_0 = arith.constant 0 : index
    %0 = vector.load %arg2[%c0, %c0_0] : memref<32x128xbf16, #tpu.memory_space<vmem>>, vector<32x128xbf16>
    %c0_1 = arith.constant 0 : index
    %c0_2 = arith.constant 0 : index
    %1 = vector.load %arg3[%c0_1, %c0_2] : memref<128x128xbf16, #tpu.memory_space<vmem>>, vector<128x128xbf16>
    %cst = arith.constant dense<0.000000e+00> : vector<32x128xf32>
    %2 = tpu.matmul %0, %1, %cst {dimension_numbers = #tpu.dot_dimension_numbers<[1], [0], [0], [1], [0, 0, 1, 1], [], []>} : vector<32x128xbf16>, vector<128x128xbf16>, vector<32x128xf32> -> vector<32x128xf32>
    %c0_3 = arith.constant 0 : index
    %c0_4 = arith.constant 0 : index
    %3 = vector.load %arg4[%c0_3, %c0_4] : memref<1x128xf32, #tpu.memory_space<vmem>>, vector<1x128xf32>
    %4 = vector.broadcast %3 : vector<1x128xf32> to vector<32x128xf32>
    %5 = arith.addf %2, %4 : vector<32x128xf32>
    %c0_5 = arith.constant 0 : index
    %c0_6 = arith.constant 0 : index
    %6 = vector.load %arg5[%c0_5, %c0_6] : memref<32x128xf32, #tpu.memory_space<vmem>>, vector<32x128xf32>
    tpu.vector_store %arg5[%c0_5, %c0_6], %5 {strides = array<i32>} : memref<32x128xf32, #tpu.memory_space<vmem>>, vector<32x128xf32>,
    return
  }
  func.func @transform_0(%arg0: i32, %arg1: i32) -> (i32, i32) {
    %c0_i32 = arith.constant 0 : i32
    %c0_i32_0 = arith.constant 0 : i32
    return %arg0, %c0_i32 : i32, i32
  }
  func.func @transform_1(%arg0: i32, %arg1: i32) -> (i32, i32) {
    %c0_i32 = arith.constant 0 : i32
    %c0_i32_0 = arith.constant 0 : i32
    return %c0_i32, %arg1 : i32, i32
  }
  func.func @transform_2(%arg0: i32, %arg1: i32) -> (i32, i32) {
    %c0_i32 = arith.constant 0 : i32
    %c0_i32_0 = arith.constant 0 : i32
    return %c0_i32, %arg1 : i32, i32
  }
  func.func @transform_3(%arg0: i32, %arg1: i32) -> (i32, i32) {
    %c0_i32 = arith.constant 0 : i32
    return %arg0, %arg1 : i32, i32
  }
}

</mosaic_0001>

<bundles_post_ra>
// kernel: patch_embed.2
= control target key start
LH: loop header
LB: loop body
LE: loop exit
PB: predicated region body
PF: predicated region fallthrough
CT: control target
= control target key end

     0   :  { %s416_s0 = inlined_call_operand.vmem [shape: bf16[128,128], index: 0, kind: input, shape index: {}]   ;;  %s417_s1 = inlined_call_operand.vmem [shape: f32[1,128], index: 1, kind: input, shape index: {}]   ;;  %s418_s2 = inlined_call_operand.vmem [shape: bf16[32,64], index: 2, kind: input, shape index: {}]   ;;  %s419_s3 = inlined_call_operand.<no memory space> [shape: bf16[], index: 3, kind: input, shape index: {}]   ;;  %s420_s4 = inlined_call_operand.hbm [shape: f32[32,128], index: 4, kind: output, shape index: {}]  }
   0x1   :  { %v9_v0 = vstv %s419_s3 }
   0x2   :  { %v10_v1 = vunpack.i.l.bf16 %v9_v0 }
   0x3   :  { %v316_v2 = vld [vmem:[%s416_s0 + $0x38] sm:$0xff]   ;;  %v33_v3 = vlaneseq  ;;  %v317_v4 = vld [vmem:[%s416_s0 + $0x30] sm:$0xff]   ;;  %v318_v5 = vld [vmem:[%s416_s0 + $0x28] sm:$0xff]  }
   0x4   :  { %292 = vmatprep.subr.bf16.mxu0 %v316_v2  ;;  %v319_v7 = vld [vmem:[%s416_s0 + $0x20] sm:$0xff]   ;;  %v269_v9 = vld [vmem:[%s418_s2 + $0x8] sm:$0xff]  }
   0x5   :  { %293 = vmatpush3.bf16.msra.mxu0 %v316_v2  ;;  %v34_v6 = vand.u32 127, %v33_v3  ;;  %v30_v8 = vld [vmem:[%s418_s2] sm:$0xff]  }
   0x6   :  { %294 = vmatprep.subr.bf16.mxu0 %v317_v4 }
   0x7   :  { %vm36_vm0 = vcmp.lt.s32.totalorder %v34_v6, 64 }
   0x9   :  { %295 = vmatpush3.bf16.msra.mxu0 %v317_v4 }
   0xa   :  { %296 = vmatprep.subr.bf16.mxu0 %v318_v5 }
   0xb   :  { %14 = vsyncpa [#allocation8], 0  ;;  %v31_v10 = vunpack.c.l.bf16 %v30_v8  ;;  %v53_v11 = vunpack.c.h.bf16 %v30_v8  ;;  %v76_v12 = vunpack.c.l.bf16 %v269_v9  ;;  %v99_v13 = vunpack.c.h.bf16 %v269_v9  ;;  %v320_v18 = vld [vmem:[%s416_s0 + $0x18] sm:$0xff]   ;;  %v321_v24 = vld [vmem:[%s416_s0 + $0x10] sm:$0xff]   ;;  %s349_s11 = smov [#allocation7]  }
   0xc   :  { %v348_v19 = vmov 0.0   ;;  %v322_v25 = vld [vmem:[%s416_s0 + $0x8] sm:$0xff]   ;;  %v323_v27 = vld [vmem:[%s416_s0] sm:$0xff]   ;;  %s257_s12 = sshll.u32 %s349_s11, 4  ;;  %s258_s12 = int_to_ptr.vmem [resolvable:$true] %s257_s12 }
   0xd   :  { %297 = vmatpush3.bf16.msra.mxu0 %v318_v5  ;;  %v37_v14 = vsel %vm36_vm0, %v31_v10, %v10_v1  ;;  %v59_v15 = vsel %vm36_vm0, %v53_v11, %v10_v1  ;;  %v82_v16 = vsel %vm36_vm0, %v76_v12, %v10_v1  ;;  %v105_v17 = vsel %vm36_vm0, %v99_v13, %v10_v1  ;;  %v271_v29 = vld [vmem:[%s417_s1] ss:$0 sm:$0xff]  ;;  %s326_s0 = scalar_lea.vmem %s258_s12, 512  ;;  %p331_p1 = scmp.lt.s32.totalorder %s258_s12, %s258_s12 }
   0xe   :  { %298 = vmatprep.subr.bf16.mxu0 %v319_v7  ;;  %v38_v20 = vpack.c.bf16 %v348_v19, %v37_v14  ;;  %v61_v21 = vpack.c.bf16 %v348_v19, %v59_v15  ;;  %v84_v22 = vpack.c.bf16 %v348_v19, %v82_v16  ;;  %v107_v23 = vpack.c.bf16 %v348_v19, %v105_v17  ;;  %p327_p0 = scmp.ne.s32.totalorder %s258_s12, %s326_s0  ;;  %p332_p2 = scmp.lt.s32.totalorder %s326_s0, %s326_s0 }
  0x10   :  { %41 = vst [vmem:[#allocation9] sm:$0xf] %v38_v20  ;;  %64 = vst [vmem:[#allocation9 + $0x4] sm:$0xf] %v61_v21  ;;  %p333_p3 = por %p332_p2, %p331_p1 }
  0x11   :  { %87 = vst [vmem:[#allocation9 + $0x8] sm:$0xf] %v84_v22  ;;  %110 = vst [vmem:[#allocation9 + $0xc] sm:$0xf] %v107_v23  ;;  %299 = vmatpush3.bf16.msra.mxu0 %v319_v7 }
  0x12   :  { %300 = vmatprep.subr.bf16.mxu0 %v320_v18  ;;  %p334_p4 = pnand %p333_p3, %p327_p0 }
  0x15   :  { %301 = vmatpush3.bf16.msra.mxu0 %v320_v18 }
  0x16   :  { %302 = vmatprep.subr.bf16.mxu0 %v321_v24 }
  0x17   :  { %v324_v26 = vld [vmem:[#allocation9] sm:$0xff]  }
  0x18   :  { %308 = vmatprep.mubr.bf16.mxu0 %v324_v26  ;;  %v325_v28 = vld [vmem:[#allocation9 + $0x8] sm:$0xff]  }
  0x19   :  { %303 = vmatpush3.bf16.msra.mxu0 %v321_v24 }
  0x1a   :  { %304 = vmatprep.subr.bf16.mxu0 %v322_v25 }
  0x1d   :  { %305 = vmatpush3.bf16.msra.mxu0 %v322_v25 }
  0x1e   :  { %306 = vmatprep.subr.bf16.mxu0 %v323_v27 }
  0x21   :  { %307 = vmatpush3.bf16.msra.mxu0 %v323_v27 }
  0x24   :  { %309 = vmatmul.mubr.bf16.vlgmr.msra.gmra.mxu0 %v325_v28 }
  0xe4   :  { %v310_v30 = vpop.f32.mrf.mxu0 }
  0xe5   :  { %v242_v31 = vadd.f32 %v310_v30, %v271_v29 }
  0xe6   :  { %v233_v32 = vpop.f32.mrf.mxu0 }
  0xe7   :  { %250 = vst [vmem:[#allocation7 + $0x10] sm:$0xff] %v242_v31  ;;  %v234_v33 = vadd.f32 %v271_v29, %v233_v32 }
  0xe8   :  { %v311_v34 = vpop.f32.mrf.mxu0 }
  0xe9   :  { %248 = vst [vmem:[#allocation7] sm:$0xff] %v234_v33  ;;  %v245_v35 = vadd.f32 %v311_v34, %v271_v29 }
  0xea   :  { %v236_v36 = vpop.f32.mrf.mxu0 }
  0xeb   :  { %251 = vst [vmem:[#allocation7 + $0x18] sm:$0xff] %v245_v35  ;;  %v237_v37 = vadd.f32 %v271_v29, %v236_v36 }
  0xed   :  { %249 = vst [vmem:[#allocation7 + $0x8] sm:$0xff] %v237_v37 }
  0xee   :  { %337 = shalt.err (!%p334_p4)
}
  0xef   :  { %s350_s1 = smov 128   ;;  %s351_s13 = smov 8  }
  0xf0   :  { %263 = dma.vmem_to_hbm [thread:$0]  %s258_s12, 512, %s420_s4, [#allocation8], %s350_s1, %s350_s1, %s351_s13  }
  0xf1   :  { %346 = dma.done.wait [#allocation8], 512  }
  0xf2   :  { %347 = vsyncadd [#allocation8], 4294966784 }
  0xf3   :  { %267 = vsyncpa [#allocation8], 1 }

</bundles_post_ra>
